<compile_context>
chip_gen: v6e
topology: v6e:2x2x1
jax: 0.10.0
libtpu: 0.0.40
codegen_flags: <defaults>
</compile_context>

<pallas_src>
import jax
import jax.numpy as jnp
from jax.experimental import pallas as pl
from jax.experimental.pallas import tpu as pltpu


def _distance_loss_kernel(data_ref, out_ref):
    B = out_ref.shape[0]

    data = data_ref[...]                      # (6B, J) f32
    xs = data[0:2 * B, :]                     # [gt_x ; pred_x]   (2B, J)
    ys = data[2 * B:4 * B, :]                 # [gt_y ; pred_y]   (2B, J)
    m = data[4 * B:5 * B, :]                  # mask              (B, J)
    ctr = data[5 * B:6 * B, :]                # [cx, cy, 0, ...]  (B, J)

    # Duplicate mask / center rows for the stacked gt+pred pass (cheap
    # sublane concat of full (B, J) tiles; free under existing slack).
    m2 = jnp.concatenate([m, m], axis=0)      # (2B, J)
    ctr2 = jnp.concatenate([ctr, ctr], axis=0)
    cx2 = ctr2[:, 0:1]                        # (2B, 1)
    cy2 = ctr2[:, 1:2]                        # (2B, 1)

    # distance term for gt and pred rows in a single pass:
    # |x - cx|/2 + |y - cy|/2
    tot = (jnp.abs(xs - cx2) + jnp.abs(ys - cy2)) * 0.5    # (2B, J)

    # one masked softmax(-tot) over the stacked gt/pred rows (exactly equal to
    # softmax over the fancy-indexed valid subset).
    neg_big = jnp.float32(-1e30)
    z = jnp.where(m2 > 0.0, -tot, neg_big)                 # (2B, J)
    z = z - jnp.max(z, axis=1, keepdims=True)
    e = jnp.exp(z) * m2
    sm = e / jnp.sum(e, axis=1, keepdims=True)             # (2B, J)

    diff = jnp.abs(sm[0:B, :] - sm[B:2 * B, :]) * m        # (B, J)
    cnt = jnp.sum(m, axis=1, keepdims=True)                # (B, 1)
    # Exact division (nothing saturates the VALU here; approx reciprocal only
    # cost accuracy).
    out_ref[...] = jnp.sum(diff, axis=1, keepdims=True) / cnt


@jax.jit
def distance_loss_pallas(gt_loss_term, pred_loss_term, center_obj_bbox,
                         index_selection):
    B, J, _ = gt_loss_term.shape

    gt = gt_loss_term.astype(jnp.float32)
    pr = pred_loss_term.astype(jnp.float32)
    mask = index_selection.astype(jnp.float32)              # (B, J)
    c = center_obj_bbox[:, 0, :].astype(jnp.float32)        # (B, 2)
    cpad = jnp.pad(c, ((0, 0), (0, J - 2)))                 # (B, J)

    # Single fused input: [gt_x; pred_x; gt_y; pred_y; mask; center_pad]
    # -> (6B, J).  One DMA, one wrapper concatenate.  With B a multiple of 8
    # every B-row slice inside the kernel is sublane-aligned.
    data = jnp.concatenate(
        [gt[..., 0], pr[..., 0], gt[..., 1], pr[..., 1], mask, cpad], axis=0)

    vmem_spec = pl.BlockSpec(memory_space=pltpu.MemorySpace.VMEM)
    return pl.pallas_call(
        _distance_loss_kernel,
        out_shape=jax.ShapeDtypeStruct((B, 1), jnp.float32),
        in_specs=[vmem_spec],
        out_specs=vmem_spec,
        cost_estimate=pl.CostEstimate(
            flops=20 * B * J,
            transcendentals=2 * B * J,
            bytes_accessed=6 * B * J * 4 + B * 4),
    )(data)


def _reference(gt, pred, center, valid):
    """Pure-JAX reference mirroring the PyTorch per-sample loop semantics."""
    d_gt = jnp.abs(gt - center) / 2.0
    d_pr = jnp.abs(pred - center) / 2.0
    t_gt = d_gt[..., 0] + d_gt[..., 1]
    t_pr = d_pr[..., 0] + d_pr[..., 1]
    m = valid.astype(jnp.float32)
    neg_big = jnp.float32(-1e30)

    def sm(x):
        z = jnp.where(m > 0, -x, neg_big)
        z = z - jnp.max(z, axis=1, keepdims=True)
        e = jnp.exp(z) * m
        return e / jnp.sum(e, axis=1, keepdims=True)

    diff = jnp.abs(sm(t_gt) - sm(t_pr)) * m
    return (jnp.sum(diff, axis=1, keepdims=True)
            / jnp.sum(m, axis=1, keepdims=True))


if __name__ == "__main__":
    key = jax.random.PRNGKey(0)
    B, J = 8, 16  # batch_size, num joints (xy = 2)

    k1, k2, k3, k4 = jax.random.split(key, 4)
    gt_loss_term = jax.random.normal(k1, (B, J, 2), dtype=jnp.float32)
    pred_loss_term = jax.random.normal(k2, (B, J, 2), dtype=jnp.float32)
    center_obj_bbox = jax.random.normal(k3, (B, 1, 2), dtype=jnp.float32)
    index_selection = jax.random.bernoulli(k4, p=0.6, shape=(B, J))
    # guarantee at least one valid joint per sample (matches typical usage;
    # empty selections produce NaN in the PyTorch module as well)
    index_selection = index_selection.at[:, 0].set(True)

    out = distance_loss_pallas(gt_loss_term, pred_loss_term,
                               center_obj_bbox, index_selection)
    out = jax.block_until_ready(out)

    ref = _reference(gt_loss_term, pred_loss_term, center_obj_bbox,
                     index_selection)
    assert out.shape == (B, 1)
    # All arithmetic is exact f32 and mirrors the reference; only reduction
    # order may differ marginally between Mosaic and XLA.
    assert jnp.allclose(out, ref, atol=1e-6, rtol=1e-5)

    print("KERNEL_OK")
</pallas_src>

<mosaic_0001>
module attributes {stable_mosaic.version = 11 : i64} {
  func.func @_distance_loss_kernel(%arg0: memref<48x16xf32, #tpu.memory_space<vmem>>, %arg1: memref<8x1xf32, #tpu.memory_space<vmem>>) attributes {dimension_semantics = [], scalar_prefetch = 0 : i64, scratch_operands = 0 : i64, tpu.core_type = #tpu.core_type<tc>} {
    %c0 = arith.constant 0 : index
    %c0_0 = arith.constant 0 : index
    %0 = vector.load %arg0[%c0, %c0_0] : memref<48x16xf32, #tpu.memory_space<vmem>>, vector<48x16xf32>
    %1 = vector.extract_strided_slice %0 {offsets = [0, 0], sizes = [16, 16], strides = [1, 1]} : vector<48x16xf32> to vector<16x16xf32>
    %2 = vector.extract_strided_slice %0 {offsets = [16, 0], sizes = [16, 16], strides = [1, 1]} : vector<48x16xf32> to vector<16x16xf32>
    %3 = vector.extract_strided_slice %0 {offsets = [32, 0], sizes = [8, 16], strides = [1, 1]} : vector<48x16xf32> to vector<8x16xf32>
    %4 = vector.extract_strided_slice %0 {offsets = [40, 0], sizes = [8, 16], strides = [1, 1]} : vector<48x16xf32> to vector<8x16xf32>
    %5 = tpu.concatenate %3, %3 in 0 : vector<8x16xf32>, vector<8x16xf32> -> vector<16x16xf32>
    %6 = tpu.concatenate %4, %4 in 0 : vector<8x16xf32>, vector<8x16xf32> -> vector<16x16xf32>
    %7 = vector.extract_strided_slice %6 {offsets = [0, 0], sizes = [16, 1], strides = [1, 1]} : vector<16x16xf32> to vector<16x1xf32>
    %8 = vector.extract_strided_slice %6 {offsets = [0, 1], sizes = [16, 1], strides = [1, 1]} : vector<16x16xf32> to vector<16x1xf32>
    %9 = vector.broadcast %7 : vector<16x1xf32> to vector<16x16xf32>
    %10 = arith.subf %1, %9 : vector<16x16xf32>
    %11 = math.absf %10 : vector<16x16xf32>
    %12 = vector.broadcast %8 : vector<16x1xf32> to vector<16x16xf32>
    %13 = arith.subf %2, %12 : vector<16x16xf32>
    %14 = math.absf %13 : vector<16x16xf32>
    %15 = arith.addf %11, %14 : vector<16x16xf32>
    %cst = arith.constant 5.000000e-01 : f32
    %16 = vector.broadcast %cst : f32 to vector<16x16xf32>
    %17 = arith.mulf %15, %16 : vector<16x16xf32>
    %cst_1 = arith.constant 0.000000e+00 : f32
    %18 = vector.broadcast %cst_1 : f32 to vector<16x16xf32>
    %19 = arith.cmpf ogt, %5, %18 : vector<16x16xf32>
    %cst_2 = arith.constant 0.000000e+00 : f32
    %20 = vector.broadcast %cst_2 : f32 to vector<16x16xf32>
    %21 = arith.subf %20, %17 : vector<16x16xf32>
    %cst_3 = arith.constant -1.000000e+30 : f32
    %22 = vector.broadcast %cst_3 : f32 to vector<16x16xf32>
    %23 = arith.select %19, %21, %22 : vector<16x16xi1>, vector<16x16xf32>
    %cst_4 = arith.constant dense<0xFF800000> : vector<16xf32>
    %24 = vector.multi_reduction <maximumf>, %23, %cst_4 [1] : vector<16x16xf32> to vector<16xf32>
    %25 = vector.shape_cast %24 : vector<16xf32> to vector<16x1xf32>
    %26 = vector.broadcast %25 : vector<16x1xf32> to vector<16x16xf32>
    %27 = arith.subf %23, %26 : vector<16x16xf32>
    %28 = math.exp %27 : vector<16x16xf32>
    %29 = arith.mulf %28, %5 : vector<16x16xf32>
    %cst_5 = arith.constant dense<0.000000e+00> : vector<16xf32>
    %30 = vector.multi_reduction <add>, %29, %cst_5 [1] : vector<16x16xf32> to vector<16xf32>
    %31 = vector.shape_cast %30 : vector<16xf32> to vector<16x1xf32>
    %32 = vector.broadcast %31 : vector<16x1xf32> to vector<16x16xf32>
    %33 = arith.divf %29, %32 : vector<16x16xf32>
    %34 = vector.extract_strided_slice %33 {offsets = [0, 0], sizes = [8, 16], strides = [1, 1]} : vector<16x16xf32> to vector<8x16xf32>
    %35 = vector.extract_strided_slice %33 {offsets = [8, 0], sizes = [8, 16], strides = [1, 1]} : vector<16x16xf32> to vector<8x16xf32>
    %36 = arith.subf %34, %35 : vector<8x16xf32>
    %37 = math.absf %36 : vector<8x16xf32>
    %38 = arith.mulf %37, %3 : vector<8x16xf32>
    %cst_6 = arith.constant dense<0.000000e+00> : vector<8xf32>
    %39 = vector.multi_reduction <add>, %3, %cst_6 [1] : vector<8x16xf32> to vector<8xf32>
    %40 = vector.shape_cast %39 : vector<8xf32> to vector<8x1xf32>
    %cst_7 = arith.constant dense<0.000000e+00> : vector<8xf32>
    %41 = vector.multi_reduction <add>, %38, %cst_7 [1] : vector<8x16xf32> to vector<8xf32>
    %42 = vector.shape_cast %41 : vector<8xf32> to vector<8x1xf32>
    %43 = arith.divf %42, %40 : vector<8x1xf32>
    %c0_8 = arith.constant 0 : index
    %c0_9 = arith.constant 0 : index
    %44 = vector.load %arg1[%c0_8, %c0_9] : memref<8x1xf32, #tpu.memory_space<vmem>>, vector<8x1xf32>
    tpu.vector_store %arg1[%c0_8, %c0_9], %43 {strides = array<i32>} : memref<8x1xf32, #tpu.memory_space<vmem>>, vector<8x1xf32>,
    return
  }
}

</mosaic_0001>

<bundles_post_ra>
// kernel: distance_loss_pallas.1
= control target key start
LH: loop header
LB: loop body
LE: loop exit
PB: predicated region body
PF: predicated region fallthrough
CT: control target
= control target key end

     0   :  { %v96_v0 = vmov 0   ;;  %v97_v2 = vmov 1   ;;  %vm40_vm1 = vcmask 130048   ;;  %vm76_vm2 = vcmask 7168   ;;  %s135_s0 = inlined_call_operand.vmem [shape: f32[48,16], index: 0, kind: input, shape index: {}]   ;;  %s136_s1 = inlined_call_operand.vmem [shape: f32[8,1], index: 1, kind: output, shape index: {}]  }
   0x1   :  { %84 = vset.pattern.permute.xlu0 %v96_v0  ;;  %v13_v1 = vld [vmem:[%s135_s0 + $0x28] sm:$0xff]  ;;  %v8_v4 = vld [vmem:[%s135_s0] sm:$0xff]  ;;  %v10_v7 = vld [vmem:[%s135_s0 + $0x10] sm:$0xff] }
   0x2   :  { %16 = vperm.xlu0 %84, %v13_v1   ;;  %v9_v5 = vld [vmem:[%s135_s0 + $0x8] sm:$0xff]  ;;  %v11_v8 = vld [vmem:[%s135_s0 + $0x18] sm:$0xff]  ;;  %v12_v18 = vld [vmem:[%s135_s0 + $0x20] sm:$0xff] }
   0x3   :  { %vm35_vm0 = vcmp.gt.f32.partialorder %v12_v18, 0.0  ;;  %v68_v40 = vsel %vm40_vm1, %v12_v18, 0.0 }
   0x6   :  { %85 = vset.pattern.permute.xlu0 %v97_v2 }
   0x7   :  { %24 = vperm.xlu0 %85, %v13_v1  }
  0x7d   :  { %v17_v3 = vpop.permute.xlu0 %16 }
  0x7e   :  { %v19_v6 = vsub.f32 %v8_v4, %v17_v3  ;;  %v20_v9 = vsub.f32 %v9_v5, %v17_v3 }
  0x80   :  { %v21_v13 = vand.u32 2147483647, %v19_v6  ;;  %v22_v14 = vand.u32 2147483647, %v20_v9 }
  0x82   :  { %v25_v10 = vpop.permute.xlu0 %24 }
  0x83   :  { %v27_v11 = vsub.f32 %v10_v7, %v25_v10  ;;  %v28_v12 = vsub.f32 %v11_v8, %v25_v10 }
  0x85   :  { %v29_v15 = vand.u32 2147483647, %v27_v11  ;;  %v30_v16 = vand.u32 2147483647, %v28_v12 }
  0x87   :  { %v32_v17 = vadd.f32 %v30_v16, %v22_v14  ;;  %v31_v19 = vadd.f32 %v29_v15, %v21_v13 }
  0x89   :  { %v33_v20 = vmul.f32 0.5, %v31_v19  ;;  %v34_v21 = vmul.f32 0.5, %v32_v17 }
  0x8b   :  { %v36_v22 = vsub.f32 0.0, %v33_v20  ;;  %v37_v23 = vsub.f32 0.0, %v34_v21 }
  0x8d   :  { %v38_v24 = vsel %vm35_vm0, %v36_v22, -1e+30  ;;  %v39_v26 = vsel %vm35_vm0, %v37_v23, -1e+30 }
  0x8e   :  { %v41_v25 = vsel %vm40_vm1, %v38_v24, -inf  ;;  %v44_v27 = vsel %vm40_vm1, %v39_v26, -inf }
  0x8f   :  { %42 = vmax.xlane.f32.xlu1 %v41_v25 }
  0x93   :  { %45 = vmax.xlane.f32.xlu1 %v44_v27 }
 0x118   :  { %v43_v28 = vpop.xlane.xlu1 %42 }
 0x119   :  { %v47_v29 = vsub.f32 %v38_v24, %v43_v28 }
 0x11b   :  { %v49_v30 = vmul.f32 1.442695, %v47_v29 }
 0x11c   :  { %v46_v31 = vpop.xlane.xlu1 %45 }
 0x11d   :  { %86 = vpow2.f32 %v49_v30  ;;  %v48_v32 = vsub.f32 %v39_v26, %v46_v31 }
 0x11f   :  { %v51_v33 = vmul.f32 1.442695, %v48_v32 }
 0x121   :  { %88 = vpow2.f32 %v51_v33 }
 0x12a   :  { %v87_v34 = vpop.eup %86 }
 0x12b   :  { %v53_v35 = vmul.f32 %v87_v34, %v12_v18 }
 0x12d   :  { %v55_v36 = vsel %vm40_vm1, %v53_v35, 0.0 }
 0x12e   :  { %v89_v37 = vpop.eup %88  ;;  %56 = vadd.xlane.f32.xlu1 %v55_v36 }
 0x12f   :  { %v54_v38 = vmul.f32 %v89_v37, %v12_v18 }
 0x131   :  { %v58_v39 = vsel %vm40_vm1, %v54_v38, 0.0 }
 0x132   :  { %59 = vadd.xlane.f32.xlu0 %v58_v39  ;;  %69 = vadd.xlane.f32.xlu1 %v68_v40 }
 0x1b7   :  { %v57_v41 = vpop.xlane.xlu1 %56 }
 0x1b8   :  { %90 = vrcp.f32 %v57_v41 }
 0x1bb   :  { %v60_v42 = vpop.xlane.xlu0 %59  ;;  %v70_v51 = vpop.xlane.xlu1 %69 }
 0x1bc   :  { %92 = vrcp.f32 %v60_v42 }
 0x1bd   :  { %94 = vrcp.f32 %v70_v51 }
 0x1c5   :  { %v91_v43 = vpop.eup %90 }
 0x1c6   :  { %v62_v45 = vmul.f32 %v91_v43, %v53_v35 }
 0x1c9   :  { %v93_v44 = vpop.eup %92 }
 0x1ca   :  { %v64_v46 = vmul.f32 %v93_v44, %v54_v38  ;;  %v95_v52 = vpop.eup %94 }
 0x1cc   :  { %v65_v47 = vsub.f32 %v62_v45, %v64_v46 }
 0x1ce   :  { %v66_v48 = vand.u32 2147483647, %v65_v47 }
 0x1d0   :  { %v67_v49 = vmul.f32 %v66_v48, %v12_v18 }
 0x1d2   :  { %v71_v50 = vsel %vm40_vm1, %v67_v49, 0.0 }
 0x1d3   :  { %72 = vadd.xlane.f32.xlu1 %v71_v50 }
 0x25c   :  { %v73_v53 = vpop.xlane.xlu1 %72 }
 0x25d   :  { %v75_v54 = vmul.f32 %v95_v52, %v73_v53 }
 0x25f   :  { %77 = vst.msk [vmem:[%s136_s1] sm:$0xff] %vm76_vm2, %v75_v54 }

</bundles_post_ra>
